<compile_context>
chip_gen: v5e
topology: v5e:2x2
jax: 0.10.0
libtpu: 0.0.40
codegen_flags: <defaults>
</compile_context>

<pallas_src>
import functools

import jax
import jax.numpy as jnp
from jax import lax
from jax.experimental import pallas as pl
from jax.experimental.pallas import tpu as pltpu


def _attn_kernel(x_ref, wqkv_ref, wo_ref, bias_ref, o_ref, *,
                 batch, seq, heads, head_dim):
    """Single invocation: fused QKV over all (batch*seq) rows, per-(batch,
    head) rel-pos-biased causal attention on tiny (seq, seq) blocks, and the
    output projection folded into the head loop."""
    D = heads * head_dim
    x = x_ref[...]                                                  # (B*N, D)

    # One fused QKV weight push: (B*N, D) @ (D, 3D).  Wq slice is pre-scaled
    # by 1/sqrt(head_dim) in the wrapper.
    qkv = jnp.dot(x, wqkv_ref[...], preferred_element_type=jnp.float32)

    wo = wo_ref[...]                                                # (D, D)
    bias = bias_ref[...]                                            # (H, N, N)

    for b in range(batch):                     # static unrolled loop (B=2)
        r0 = b * seq
        acc = jnp.zeros((seq, D), jnp.float32)
        for h in range(heads):                 # static unrolled loop (H=4)
            c0 = h * head_dim
            qh = qkv[r0:r0 + seq, c0:c0 + head_dim]                 # (N, d)
            kh = qkv[r0:r0 + seq, D + c0:D + c0 + head_dim]         # (N, d)
            vh = qkv[r0:r0 + seq, 2 * D + c0:2 * D + c0 + head_dim]

            # Scores: contract last dims (no transpose), add fused bias
            # (alpha * Srel / sqrt(d) + additive causal -1e30 mask).
            s = lax.dot_general(qh, kh, (((1,), (1,)), ((), ())),
                                preferred_element_type=jnp.float32)  # (N, N)
            s = s + bias[h]

            # Softmax over keys — exact division (kernel is not EUP-bound).
            m = jnp.max(s, axis=-1, keepdims=True)
            p = jnp.exp(s - m)
            attn = p / jnp.sum(p, axis=-1, keepdims=True)

            oh = jnp.dot(attn, vh, preferred_element_type=jnp.float32)  # (N, d)
            # Fold Wo per head (avoids concatenating head outputs).
            acc = acc + jnp.dot(oh, wo[c0:c0 + head_dim, :],
                                preferred_element_type=jnp.float32)     # (N, D)

        o_ref[r0:r0 + seq, :] = acc


def simple_relative_attention(x, wq, wk, wv, wo, rel_emb, *,
                              heads, max_seq_len, alpha=1.0):
    """x: (B, N, D) float32. wq/wk/wv/wo: (D, D) Linear weights (out, in).
    rel_emb: (max_seq_len, heads) embedding table. Returns (B, N, D).

    Implements the default forward path (cache=None, return_cached_kv=False).
    """
    B, N, D = x.shape
    d = D // heads
    scale = 1.0 / (d ** 0.5)

    # Fused, pre-transposed QKV weight; fold 1/sqrt(d) into the Wq slice.
    wqkv = jnp.concatenate(
        [wq.T * scale, wk.T, wv.T], axis=1).astype(jnp.float32)      # (D, 3D)
    wo_t = wo.T.astype(jnp.float32)                                  # (D, D)

    # Fused bias: alpha * Srel / sqrt(d) + additive causal mask.
    # Srel[h, i, j] = rel_emb[clamp(i - j, 0, max_seq_len - 1), h]
    i_pos = jnp.arange(N)[:, None]
    j_pos = jnp.arange(N)[None, :]
    rel_pos = jnp.clip(i_pos - j_pos, 0, max_seq_len - 1)
    srel = jnp.transpose(rel_emb[rel_pos], (2, 0, 1)).astype(jnp.float32)  # (H,N,N)
    mask_add = jnp.where(j_pos > i_pos, -1e30, 0.0).astype(jnp.float32)    # (N,N)
    bias_fused = (float(alpha) * scale) * srel + mask_add[None]            # (H,N,N)

    # Fold batch into rows: one kernel step, full-width projections.
    x2d = x.reshape(B * N, D).astype(jnp.float32)

    kernel = functools.partial(_attn_kernel, batch=B, seq=N,
                               heads=heads, head_dim=d)

    out2d = pl.pallas_call(
        kernel,
        out_shape=jax.ShapeDtypeStruct((B * N, D), jnp.float32),
        in_specs=[pl.BlockSpec(memory_space=pltpu.MemorySpace.VMEM)] * 4,
        out_specs=pl.BlockSpec(memory_space=pltpu.MemorySpace.VMEM),
    )(x2d, wqkv, wo_t, bias_fused)

    return out2d.reshape(B, N, D)


def _reference(x, wq, wk, wv, wo, rel_emb, *, heads, max_seq_len, alpha):
    """Pure-JAX reference mirroring the PyTorch forward."""
    B, N, D = x.shape
    d = D // heads
    q = (x @ wq.T).reshape(B, N, heads, d).transpose(0, 2, 1, 3)
    k = (x @ wk.T).reshape(B, N, heads, d).transpose(0, 2, 1, 3)
    v = (x @ wv.T).reshape(B, N, heads, d).transpose(0, 2, 1, 3)
    qk = jnp.einsum('bhid,bhjd->bhij', q, k)
    rel_pos = jnp.clip(jnp.arange(N)[:, None] - jnp.arange(N)[None, :],
                       0, max_seq_len - 1)
    srel = jnp.transpose(rel_emb[rel_pos], (2, 0, 1))[None]  # (1,H,N,N)
    dots = (qk + alpha * srel) / (d ** 0.5)
    causal = jnp.triu(jnp.ones((N, N), dtype=bool), k=1)
    dots = jnp.where(causal, -jnp.finfo(dots.dtype).max, dots)
    attn = jax.nn.softmax(dots, axis=-1)
    out = jnp.einsum('bhij,bhjd->bhid', attn, v)
    out = out.transpose(0, 2, 1, 3).reshape(B, N, D)
    return out @ wo.T


if __name__ == "__main__":
    # cfg: dim=32, heads=4, dropout=0, alpha=1.0; max_seq_len=16; x: (2, 8, 32)
    B, N, D, H = 2, 8, 32, 4
    MAX_SEQ_LEN = 16
    ALPHA = 1.0

    key = jax.random.PRNGKey(0)
    kx, kq, kk, kv, ko, ke = jax.random.split(key, 6)
    wscale = 1.0 / (D ** 0.5)
    x = jax.random.normal(kx, (B, N, D), dtype=jnp.float32)
    wq = jax.random.normal(kq, (D, D), dtype=jnp.float32) * wscale
    wk = jax.random.normal(kk, (D, D), dtype=jnp.float32) * wscale
    wv = jax.random.normal(kv, (D, D), dtype=jnp.float32) * wscale
    wo = jax.random.normal(ko, (D, D), dtype=jnp.float32) * wscale
    rel_emb = jax.random.normal(ke, (MAX_SEQ_LEN, H), dtype=jnp.float32)

    out = simple_relative_attention(
        x, wq, wk, wv, wo, rel_emb,
        heads=H, max_seq_len=MAX_SEQ_LEN, alpha=ALPHA)
    out = jax.block_until_ready(out)

    ref = _reference(x, wq, wk, wv, wo, rel_emb,
                     heads=H, max_seq_len=MAX_SEQ_LEN, alpha=ALPHA)
    assert out.shape == (B, N, D)
    assert jnp.allclose(out, ref, atol=1e-4, rtol=1e-4), "mismatch vs reference"

    print("KERNEL_OK")
</pallas_src>

<mosaic_0001>
module attributes {stable_mosaic.version = 11 : i64} {
  func.func @_attn_kernel(%arg0: memref<16x32xf32, #tpu.memory_space<vmem>>, %arg1: memref<32x96xf32, #tpu.memory_space<vmem>>, %arg2: memref<32x32xf32, #tpu.memory_space<vmem>>, %arg3: memref<4x8x8xf32, #tpu.memory_space<vmem>>, %arg4: memref<16x32xf32, #tpu.memory_space<vmem>>) attributes {dimension_semantics = [], scalar_prefetch = 0 : i64, scratch_operands = 0 : i64, tpu.core_type = #tpu.core_type<tc>} {
    %c0 = arith.constant 0 : index
    %c0_0 = arith.constant 0 : index
    %0 = vector.load %arg0[%c0, %c0_0] : memref<16x32xf32, #tpu.memory_space<vmem>>, vector<16x32xf32>
    %c0_1 = arith.constant 0 : index
    %c0_2 = arith.constant 0 : index
    %1 = vector.load %arg1[%c0_1, %c0_2] : memref<32x96xf32, #tpu.memory_space<vmem>>, vector<32x96xf32>
    %cst = arith.constant dense<0.000000e+00> : vector<16x96xf32>
    %2 = tpu.matmul %0, %1, %cst {dimension_numbers = #tpu.dot_dimension_numbers<[1], [0], [0], [1], [0, 0, 1, 1], [], []>} : vector<16x32xf32>, vector<32x96xf32>, vector<16x96xf32> -> vector<16x96xf32>
    %c0_3 = arith.constant 0 : index
    %c0_4 = arith.constant 0 : index
    %3 = vector.load %arg2[%c0_3, %c0_4] : memref<32x32xf32, #tpu.memory_space<vmem>>, vector<32x32xf32>
    %c0_5 = arith.constant 0 : index
    %c0_6 = arith.constant 0 : index
    %c0_7 = arith.constant 0 : index
    %4 = vector.load %arg3[%c0_5, %c0_6, %c0_7] : memref<4x8x8xf32, #tpu.memory_space<vmem>>, vector<4x8x8xf32>
    %cst_8 = arith.constant 0.000000e+00 : f32
    %5 = vector.broadcast %cst_8 : f32 to vector<8x32xf32>
    %6 = vector.extract_strided_slice %2 {offsets = [0, 0], sizes = [8, 8], strides = [1, 1]} : vector<16x96xf32> to vector<8x8xf32>
    %7 = vector.extract_strided_slice %2 {offsets = [0, 32], sizes = [8, 8], strides = [1, 1]} : vector<16x96xf32> to vector<8x8xf32>
    %8 = vector.extract_strided_slice %2 {offsets = [0, 64], sizes = [8, 8], strides = [1, 1]} : vector<16x96xf32> to vector<8x8xf32>
    %cst_9 = arith.constant dense<0.000000e+00> : vector<8x8xf32>
    %9 = tpu.matmul %6, %7, %cst_9 {dimension_numbers = #tpu.dot_dimension_numbers<[1], [1], [0], [0], [0, 0, 1, 0], [], []>} : vector<8x8xf32>, vector<8x8xf32>, vector<8x8xf32> -> vector<8x8xf32>
    %10 = vector.extract_strided_slice %4 {offsets = [0, 0, 0], sizes = [1, 8, 8], strides = [1, 1, 1]} : vector<4x8x8xf32> to vector<1x8x8xf32>
    %11 = vector.shape_cast %10 : vector<1x8x8xf32> to vector<8x8xf32>
    %12 = arith.addf %9, %11 : vector<8x8xf32>
    %cst_10 = arith.constant dense<0xFF800000> : vector<8xf32>
    %13 = vector.multi_reduction <maximumf>, %12, %cst_10 [1] : vector<8x8xf32> to vector<8xf32>
    %14 = vector.shape_cast %13 : vector<8xf32> to vector<8x1xf32>
    %15 = vector.broadcast %14 : vector<8x1xf32> to vector<8x8xf32>
    %16 = arith.subf %12, %15 : vector<8x8xf32>
    %17 = math.exp %16 : vector<8x8xf32>
    %cst_11 = arith.constant dense<0.000000e+00> : vector<8xf32>
    %18 = vector.multi_reduction <add>, %17, %cst_11 [1] : vector<8x8xf32> to vector<8xf32>
    %19 = vector.shape_cast %18 : vector<8xf32> to vector<8x1xf32>
    %20 = vector.broadcast %19 : vector<8x1xf32> to vector<8x8xf32>
    %21 = arith.divf %17, %20 : vector<8x8xf32>
    %cst_12 = arith.constant dense<0.000000e+00> : vector<8x8xf32>
    %22 = tpu.matmul %21, %8, %cst_12 {dimension_numbers = #tpu.dot_dimension_numbers<[1], [0], [0], [1], [0, 0, 1, 1], [], []>} : vector<8x8xf32>, vector<8x8xf32>, vector<8x8xf32> -> vector<8x8xf32>
    %23 = vector.extract_strided_slice %3 {offsets = [0, 0], sizes = [8, 32], strides = [1, 1]} : vector<32x32xf32> to vector<8x32xf32>
    %cst_13 = arith.constant dense<0.000000e+00> : vector<8x32xf32>
    %24 = tpu.matmul %22, %23, %cst_13 {dimension_numbers = #tpu.dot_dimension_numbers<[1], [0], [0], [1], [0, 0, 1, 1], [], []>} : vector<8x8xf32>, vector<8x32xf32>, vector<8x32xf32> -> vector<8x32xf32>
    %25 = arith.addf %5, %24 : vector<8x32xf32>
    %26 = vector.extract_strided_slice %2 {offsets = [0, 8], sizes = [8, 8], strides = [1, 1]} : vector<16x96xf32> to vector<8x8xf32>
    %27 = vector.extract_strided_slice %2 {offsets = [0, 40], sizes = [8, 8], strides = [1, 1]} : vector<16x96xf32> to vector<8x8xf32>
    %28 = vector.extract_strided_slice %2 {offsets = [0, 72], sizes = [8, 8], strides = [1, 1]} : vector<16x96xf32> to vector<8x8xf32>
    %cst_14 = arith.constant dense<0.000000e+00> : vector<8x8xf32>
    %29 = tpu.matmul %26, %27, %cst_14 {dimension_numbers = #tpu.dot_dimension_numbers<[1], [1], [0], [0], [0, 0, 1, 0], [], []>} : vector<8x8xf32>, vector<8x8xf32>, vector<8x8xf32> -> vector<8x8xf32>
    %30 = vector.extract_strided_slice %4 {offsets = [1, 0, 0], sizes = [1, 8, 8], strides = [1, 1, 1]} : vector<4x8x8xf32> to vector<1x8x8xf32>
    %31 = vector.shape_cast %30 : vector<1x8x8xf32> to vector<8x8xf32>
    %32 = arith.addf %29, %31 : vector<8x8xf32>
    %cst_15 = arith.constant dense<0xFF800000> : vector<8xf32>
    %33 = vector.multi_reduction <maximumf>, %32, %cst_15 [1] : vector<8x8xf32> to vector<8xf32>
    %34 = vector.shape_cast %33 : vector<8xf32> to vector<8x1xf32>
    %35 = vector.broadcast %34 : vector<8x1xf32> to vector<8x8xf32>
    %36 = arith.subf %32, %35 : vector<8x8xf32>
    %37 = math.exp %36 : vector<8x8xf32>
    %cst_16 = arith.constant dense<0.000000e+00> : vector<8xf32>
    %38 = vector.multi_reduction <add>, %37, %cst_16 [1] : vector<8x8xf32> to vector<8xf32>
    %39 = vector.shape_cast %38 : vector<8xf32> to vector<8x1xf32>
    %40 = vector.broadcast %39 : vector<8x1xf32> to vector<8x8xf32>
    %41 = arith.divf %37, %40 : vector<8x8xf32>
    %cst_17 = arith.constant dense<0.000000e+00> : vector<8x8xf32>
    %42 = tpu.matmul %41, %28, %cst_17 {dimension_numbers = #tpu.dot_dimension_numbers<[1], [0], [0], [1], [0, 0, 1, 1], [], []>} : vector<8x8xf32>, vector<8x8xf32>, vector<8x8xf32> -> vector<8x8xf32>
    %43 = vector.extract_strided_slice %3 {offsets = [8, 0], sizes = [8, 32], strides = [1, 1]} : vector<32x32xf32> to vector<8x32xf32>
    %cst_18 = arith.constant dense<0.000000e+00> : vector<8x32xf32>
    %44 = tpu.matmul %42, %43, %cst_18 {dimension_numbers = #tpu.dot_dimension_numbers<[1], [0], [0], [1], [0, 0, 1, 1], [], []>} : vector<8x8xf32>, vector<8x32xf32>, vector<8x32xf32> -> vector<8x32xf32>
    %45 = arith.addf %25, %44 : vector<8x32xf32>
    %46 = vector.extract_strided_slice %2 {offsets = [0, 16], sizes = [8, 8], strides = [1, 1]} : vector<16x96xf32> to vector<8x8xf32>
    %47 = vector.extract_strided_slice %2 {offsets = [0, 48], sizes = [8, 8], strides = [1, 1]} : vector<16x96xf32> to vector<8x8xf32>
    %48 = vector.extract_strided_slice %2 {offsets = [0, 80], sizes = [8, 8], strides = [1, 1]} : vector<16x96xf32> to vector<8x8xf32>
    %cst_19 = arith.constant dense<0.000000e+00> : vector<8x8xf32>
    %49 = tpu.matmul %46, %47, %cst_19 {dimension_numbers = #tpu.dot_dimension_numbers<[1], [1], [0], [0], [0, 0, 1, 0], [], []>} : vector<8x8xf32>, vector<8x8xf32>, vector<8x8xf32> -> vector<8x8xf32>
    %50 = vector.extract_strided_slice %4 {offsets = [2, 0, 0], sizes = [1, 8, 8], strides = [1, 1, 1]} : vector<4x8x8xf32> to vector<1x8x8xf32>
    %51 = vector.shape_cast %50 : vector<1x8x8xf32> to vector<8x8xf32>
    %52 = arith.addf %49, %51 : vector<8x8xf32>
    %cst_20 = arith.constant dense<0xFF800000> : vector<8xf32>
    %53 = vector.multi_reduction <maximumf>, %52, %cst_20 [1] : vector<8x8xf32> to vector<8xf32>
    %54 = vector.shape_cast %53 : vector<8xf32> to vector<8x1xf32>
    %55 = vector.broadcast %54 : vector<8x1xf32> to vector<8x8xf32>
    %56 = arith.subf %52, %55 : vector<8x8xf32>
    %57 = math.exp %56 : vector<8x8xf32>
    %cst_21 = arith.constant dense<0.000000e+00> : vector<8xf32>
    %58 = vector.multi_reduction <add>, %57, %cst_21 [1] : vector<8x8xf32> to vector<8xf32>
    %59 = vector.shape_cast %58 : vector<8xf32> to vector<8x1xf32>
    %60 = vector.broadcast %59 : vector<8x1xf32> to vector<8x8xf32>
    %61 = arith.divf %57, %60 : vector<8x8xf32>
    %cst_22 = arith.constant dense<0.000000e+00> : vector<8x8xf32>
    %62 = tpu.matmul %61, %48, %cst_22 {dimension_numbers = #tpu.dot_dimension_numbers<[1], [0], [0], [1], [0, 0, 1, 1], [], []>} : vector<8x8xf32>, vector<8x8xf32>, vector<8x8xf32> -> vector<8x8xf32>
    %63 = vector.extract_strided_slice %3 {offsets = [16, 0], sizes = [8, 32], strides = [1, 1]} : vector<32x32xf32> to vector<8x32xf32>
    %cst_23 = arith.constant dense<0.000000e+00> : vector<8x32xf32>
    %64 = tpu.matmul %62, %63, %cst_23 {dimension_numbers = #tpu.dot_dimension_numbers<[1], [0], [0], [1], [0, 0, 1, 1], [], []>} : vector<8x8xf32>, vector<8x32xf32>, vector<8x32xf32> -> vector<8x32xf32>
    %65 = arith.addf %45, %64 : vector<8x32xf32>
    %66 = vector.extract_strided_slice %2 {offsets = [0, 24], sizes = [8, 8], strides = [1, 1]} : vector<16x96xf32> to vector<8x8xf32>
    %67 = vector.extract_strided_slice %2 {offsets = [0, 56], sizes = [8, 8], strides = [1, 1]} : vector<16x96xf32> to vector<8x8xf32>
    %68 = vector.extract_strided_slice %2 {offsets = [0, 88], sizes = [8, 8], strides = [1, 1]} : vector<16x96xf32> to vector<8x8xf32>
    %cst_24 = arith.constant dense<0.000000e+00> : vector<8x8xf32>
    %69 = tpu.matmul %66, %67, %cst_24 {dimension_numbers = #tpu.dot_dimension_numbers<[1], [1], [0], [0], [0, 0, 1, 0], [], []>} : vector<8x8xf32>, vector<8x8xf32>, vector<8x8xf32> -> vector<8x8xf32>
    %70 = vector.extract_strided_slice %4 {offsets = [3, 0, 0], sizes = [1, 8, 8], strides = [1, 1, 1]} : vector<4x8x8xf32> to vector<1x8x8xf32>
    %71 = vector.shape_cast %70 : vector<1x8x8xf32> to vector<8x8xf32>
    %72 = arith.addf %69, %71 : vector<8x8xf32>
    %cst_25 = arith.constant dense<0xFF800000> : vector<8xf32>
    %73 = vector.multi_reduction <maximumf>, %72, %cst_25 [1] : vector<8x8xf32> to vector<8xf32>
    %74 = vector.shape_cast %73 : vector<8xf32> to vector<8x1xf32>
    %75 = vector.broadcast %74 : vector<8x1xf32> to vector<8x8xf32>
    %76 = arith.subf %72, %75 : vector<8x8xf32>
    %77 = math.exp %76 : vector<8x8xf32>
    %cst_26 = arith.constant dense<0.000000e+00> : vector<8xf32>
    %78 = vector.multi_reduction <add>, %77, %cst_26 [1] : vector<8x8xf32> to vector<8xf32>
    %79 = vector.shape_cast %78 : vector<8xf32> to vector<8x1xf32>
    %80 = vector.broadcast %79 : vector<8x1xf32> to vector<8x8xf32>
    %81 = arith.divf %77, %80 : vector<8x8xf32>
    %cst_27 = arith.constant dense<0.000000e+00> : vector<8x8xf32>
    %82 = tpu.matmul %81, %68, %cst_27 {dimension_numbers = #tpu.dot_dimension_numbers<[1], [0], [0], [1], [0, 0, 1, 1], [], []>} : vector<8x8xf32>, vector<8x8xf32>, vector<8x8xf32> -> vector<8x8xf32>
    %83 = vector.extract_strided_slice %3 {offsets = [24, 0], sizes = [8, 32], strides = [1, 1]} : vector<32x32xf32> to vector<8x32xf32>
    %cst_28 = arith.constant dense<0.000000e+00> : vector<8x32xf32>
    %84 = tpu.matmul %82, %83, %cst_28 {dimension_numbers = #tpu.dot_dimension_numbers<[1], [0], [0], [1], [0, 0, 1, 1], [], []>} : vector<8x8xf32>, vector<8x32xf32>, vector<8x32xf32> -> vector<8x32xf32>
    %85 = arith.addf %65, %84 : vector<8x32xf32>
    %c0_29 = arith.constant 0 : index
    %c0_30 = arith.constant 0 : index
    %86 = vector.load %arg4[%c0_29, %c0_30] : memref<16x32xf32, #tpu.memory_space<vmem>>, vector<8x32xf32>
    tpu.vector_store %arg4[%c0_29, %c0_30], %85 {strides = array<i32>} : memref<16x32xf32, #tpu.memory_space<vmem>>, vector<8x32xf32>,
    %cst_31 = arith.constant 0.000000e+00 : f32
    %87 = vector.broadcast %cst_31 : f32 to vector<8x32xf32>
    %88 = vector.extract_strided_slice %2 {offsets = [8, 0], sizes = [8, 8], strides = [1, 1]} : vector<16x96xf32> to vector<8x8xf32>
    %89 = vector.extract_strided_slice %2 {offsets = [8, 32], sizes = [8, 8], strides = [1, 1]} : vector<16x96xf32> to vector<8x8xf32>
    %90 = vector.extract_strided_slice %2 {offsets = [8, 64], sizes = [8, 8], strides = [1, 1]} : vector<16x96xf32> to vector<8x8xf32>
    %cst_32 = arith.constant dense<0.000000e+00> : vector<8x8xf32>
    %91 = tpu.matmul %88, %89, %cst_32 {dimension_numbers = #tpu.dot_dimension_numbers<[1], [1], [0], [0], [0, 0, 1, 0], [], []>} : vector<8x8xf32>, vector<8x8xf32>, vector<8x8xf32> -> vector<8x8xf32>
    %92 = vector.extract_strided_slice %4 {offsets = [0, 0, 0], sizes = [1, 8, 8], strides = [1, 1, 1]} : vector<4x8x8xf32> to vector<1x8x8xf32>
    %93 = vector.shape_cast %92 : vector<1x8x8xf32> to vector<8x8xf32>
    %94 = arith.addf %91, %93 : vector<8x8xf32>
    %cst_33 = arith.constant dense<0xFF800000> : vector<8xf32>
    %95 = vector.multi_reduction <maximumf>, %94, %cst_33 [1] : vector<8x8xf32> to vector<8xf32>
    %96 = vector.shape_cast %95 : vector<8xf32> to vector<8x1xf32>
    %97 = vector.broadcast %96 : vector<8x1xf32> to vector<8x8xf32>
    %98 = arith.subf %94, %97 : vector<8x8xf32>
    %99 = math.exp %98 : vector<8x8xf32>
    %cst_34 = arith.constant dense<0.000000e+00> : vector<8xf32>
    %100 = vector.multi_reduction <add>, %99, %cst_34 [1] : vector<8x8xf32> to vector<8xf32>
    %101 = vector.shape_cast %100 : vector<8xf32> to vector<8x1xf32>
    %102 = vector.broadcast %101 : vector<8x1xf32> to vector<8x8xf32>
    %103 = arith.divf %99, %102 : vector<8x8xf32>
    %cst_35 = arith.constant dense<0.000000e+00> : vector<8x8xf32>
    %104 = tpu.matmul %103, %90, %cst_35 {dimension_numbers = #tpu.dot_dimension_numbers<[1], [0], [0], [1], [0, 0, 1, 1], [], []>} : vector<8x8xf32>, vector<8x8xf32>, vector<8x8xf32> -> vector<8x8xf32>
    %105 = vector.extract_strided_slice %3 {offsets = [0, 0], sizes = [8, 32], strides = [1, 1]} : vector<32x32xf32> to vector<8x32xf32>
    %cst_36 = arith.constant dense<0.000000e+00> : vector<8x32xf32>
    %106 = tpu.matmul %104, %105, %cst_36 {dimension_numbers = #tpu.dot_dimension_numbers<[1], [0], [0], [1], [0, 0, 1, 1], [], []>} : vector<8x8xf32>, vector<8x32xf32>, vector<8x32xf32> -> vector<8x32xf32>
    %107 = arith.addf %87, %106 : vector<8x32xf32>
    %108 = vector.extract_strided_slice %2 {offsets = [8, 8], sizes = [8, 8], strides = [1, 1]} : vector<16x96xf32> to vector<8x8xf32>
    %109 = vector.extract_strided_slice %2 {offsets = [8, 40], sizes = [8, 8], strides = [1, 1]} : vector<16x96xf32> to vector<8x8xf32>
    %110 = vector.extract_strided_slice %2 {offsets = [8, 72], sizes = [8, 8], strides = [1, 1]} : vector<16x96xf32> to vector<8x8xf32>
    %cst_37 = arith.constant dense<0.000000e+00> : vector<8x8xf32>
    %111 = tpu.matmul %108, %109, %cst_37 {dimension_numbers = #tpu.dot_dimension_numbers<[1], [1], [0], [0], [0, 0, 1, 0], [], []>} : vector<8x8xf32>, vector<8x8xf32>, vector<8x8xf32> -> vector<8x8xf32>
    %112 = vector.extract_strided_slice %4 {offsets = [1, 0, 0], sizes = [1, 8, 8], strides = [1, 1, 1]} : vector<4x8x8xf32> to vector<1x8x8xf32>
    %113 = vector.shape_cast %112 : vector<1x8x8xf32> to vector<8x8xf32>
    %114 = arith.addf %111, %113 : vector<8x8xf32>
    %cst_38 = arith.constant dense<0xFF800000> : vector<8xf32>
    %115 = vector.multi_reduction <maximumf>, %114, %cst_38 [1] : vector<8x8xf32> to vector<8xf32>
    %116 = vector.shape_cast %115 : vector<8xf32> to vector<8x1xf32>
    %117 = vector.broadcast %116 : vector<8x1xf32> to vector<8x8xf32>
    %118 = arith.subf %114, %117 : vector<8x8xf32>
    %119 = math.exp %118 : vector<8x8xf32>
    %cst_39 = arith.constant dense<0.000000e+00> : vector<8xf32>
    %120 = vector.multi_reduction <add>, %119, %cst_39 [1] : vector<8x8xf32> to vector<8xf32>
    %121 = vector.shape_cast %120 : vector<8xf32> to vector<8x1xf32>
    %122 = vector.broadcast %121 : vector<8x1xf32> to vector<8x8xf32>
    %123 = arith.divf %119, %122 : vector<8x8xf32>
    %cst_40 = arith.constant dense<0.000000e+00> : vector<8x8xf32>
    %124 = tpu.matmul %123, %110, %cst_40 {dimension_numbers = #tpu.dot_dimension_numbers<[1], [0], [0], [1], [0, 0, 1, 1], [], []>} : vector<8x8xf32>, vector<8x8xf32>, vector<8x8xf32> -> vector<8x8xf32>
    %125 = vector.extract_strided_slice %3 {offsets = [8, 0], sizes = [8, 32], strides = [1, 1]} : vector<32x32xf32> to vector<8x32xf32>
    %cst_41 = arith.constant dense<0.000000e+00> : vector<8x32xf32>
    %126 = tpu.matmul %124, %125, %cst_41 {dimension_numbers = #tpu.dot_dimension_numbers<[1], [0], [0], [1], [0, 0, 1, 1], [], []>} : vector<8x8xf32>, vector<8x32xf32>, vector<8x32xf32> -> vector<8x32xf32>
    %127 = arith.addf %107, %126 : vector<8x32xf32>
    %128 = vector.extract_strided_slice %2 {offsets = [8, 16], sizes = [8, 8], strides = [1, 1]} : vector<16x96xf32> to vector<8x8xf32>
    %129 = vector.extract_strided_slice %2 {offsets = [8, 48], sizes = [8, 8], strides = [1, 1]} : vector<16x96xf32> to vector<8x8xf32>
    %130 = vector.extract_strided_slice %2 {offsets = [8, 80], sizes = [8, 8], strides = [1, 1]} : vector<16x96xf32> to vector<8x8xf32>
    %cst_42 = arith.constant dense<0.000000e+00> : vector<8x8xf32>
    %131 = tpu.matmul %128, %129, %cst_42 {dimension_numbers = #tpu.dot_dimension_numbers<[1], [1], [0], [0], [0, 0, 1, 0], [], []>} : vector<8x8xf32>, vector<8x8xf32>, vector<8x8xf32> -> vector<8x8xf32>
    %132 = vector.extract_strided_slice %4 {offsets = [2, 0, 0], sizes = [1, 8, 8], strides = [1, 1, 1]} : vector<4x8x8xf32> to vector<1x8x8xf32>
    %133 = vector.shape_cast %132 : vector<1x8x8xf32> to vector<8x8xf32>
    %134 = arith.addf %131, %133 : vector<8x8xf32>
    %cst_43 = arith.constant dense<0xFF800000> : vector<8xf32>
    %135 = vector.multi_reduction <maximumf>, %134, %cst_43 [1] : vector<8x8xf32> to vector<8xf32>
    %136 = vector.shape_cast %135 : vector<8xf32> to vector<8x1xf32>
    %137 = vector.broadcast %136 : vector<8x1xf32> to vector<8x8xf32>
    %138 = arith.subf %134, %137 : vector<8x8xf32>
    %139 = math.exp %138 : vector<8x8xf32>
    %cst_44 = arith.constant dense<0.000000e+00> : vector<8xf32>
    %140 = vector.multi_reduction <add>, %139, %cst_44 [1] : vector<8x8xf32> to vector<8xf32>
    %141 = vector.shape_cast %140 : vector<8xf32> to vector<8x1xf32>
    %142 = vector.broadcast %141 : vector<8x1xf32> to vector<8x8xf32>
    %143 = arith.divf %139, %142 : vector<8x8xf32>
    %cst_45 = arith.constant dense<0.000000e+00> : vector<8x8xf32>
    %144 = tpu.matmul %143, %130, %cst_45 {dimension_numbers = #tpu.dot_dimension_numbers<[1], [0], [0], [1], [0, 0, 1, 1], [], []>} : vector<8x8xf32>, vector<8x8xf32>, vector<8x8xf32> -> vector<8x8xf32>
    %145 = vector.extract_strided_slice %3 {offsets = [16, 0], sizes = [8, 32], strides = [1, 1]} : vector<32x32xf32> to vector<8x32xf32>
    %cst_46 = arith.constant dense<0.000000e+00> : vector<8x32xf32>
    %146 = tpu.matmul %144, %145, %cst_46 {dimension_numbers = #tpu.dot_dimension_numbers<[1], [0], [0], [1], [0, 0, 1, 1], [], []>} : vector<8x8xf32>, vector<8x32xf32>, vector<8x32xf32> -> vector<8x32xf32>
    %147 = arith.addf %127, %146 : vector<8x32xf32>
    %148 = vector.extract_strided_slice %2 {offsets = [8, 24], sizes = [8, 8], strides = [1, 1]} : vector<16x96xf32> to vector<8x8xf32>
    %149 = vector.extract_strided_slice %2 {offsets = [8, 56], sizes = [8, 8], strides = [1, 1]} : vector<16x96xf32> to vector<8x8xf32>
    %150 = vector.extract_strided_slice %2 {offsets = [8, 88], sizes = [8, 8], strides = [1, 1]} : vector<16x96xf32> to vector<8x8xf32>
    %cst_47 = arith.constant dense<0.000000e+00> : vector<8x8xf32>
    %151 = tpu.matmul %148, %149, %cst_47 {dimension_numbers = #tpu.dot_dimension_numbers<[1], [1], [0], [0], [0, 0, 1, 0], [], []>} : vector<8x8xf32>, vector<8x8xf32>, vector<8x8xf32> -> vector<8x8xf32>
    %152 = vector.extract_strided_slice %4 {offsets = [3, 0, 0], sizes = [1, 8, 8], strides = [1, 1, 1]} : vector<4x8x8xf32> to vector<1x8x8xf32>
    %153 = vector.shape_cast %152 : vector<1x8x8xf32> to vector<8x8xf32>
    %154 = arith.addf %151, %153 : vector<8x8xf32>
    %cst_48 = arith.constant dense<0xFF800000> : vector<8xf32>
    %155 = vector.multi_reduction <maximumf>, %154, %cst_48 [1] : vector<8x8xf32> to vector<8xf32>
    %156 = vector.shape_cast %155 : vector<8xf32> to vector<8x1xf32>
    %157 = vector.broadcast %156 : vector<8x1xf32> to vector<8x8xf32>
    %158 = arith.subf %154, %157 : vector<8x8xf32>
    %159 = math.exp %158 : vector<8x8xf32>
    %cst_49 = arith.constant dense<0.000000e+00> : vector<8xf32>
    %160 = vector.multi_reduction <add>, %159, %cst_49 [1] : vector<8x8xf32> to vector<8xf32>
    %161 = vector.shape_cast %160 : vector<8xf32> to vector<8x1xf32>
    %162 = vector.broadcast %161 : vector<8x1xf32> to vector<8x8xf32>
    %163 = arith.divf %159, %162 : vector<8x8xf32>
    %cst_50 = arith.constant dense<0.000000e+00> : vector<8x8xf32>
    %164 = tpu.matmul %163, %150, %cst_50 {dimension_numbers = #tpu.dot_dimension_numbers<[1], [0], [0], [1], [0, 0, 1, 1], [], []>} : vector<8x8xf32>, vector<8x8xf32>, vector<8x8xf32> -> vector<8x8xf32>
    %165 = vector.extract_strided_slice %3 {offsets = [24, 0], sizes = [8, 32], strides = [1, 1]} : vector<32x32xf32> to vector<8x32xf32>
    %cst_51 = arith.constant dense<0.000000e+00> : vector<8x32xf32>
    %166 = tpu.matmul %164, %165, %cst_51 {dimension_numbers = #tpu.dot_dimension_numbers<[1], [0], [0], [1], [0, 0, 1, 1], [], []>} : vector<8x8xf32>, vector<8x32xf32>, vector<8x32xf32> -> vector<8x32xf32>
    %167 = arith.addf %147, %166 : vector<8x32xf32>
    %c8 = arith.constant 8 : index
    %c0_52 = arith.constant 0 : index
    %168 = vector.load %arg4[%c8, %c0_52] : memref<16x32xf32, #tpu.memory_space<vmem>>, vector<8x32xf32>
    tpu.vector_store %arg4[%c8, %c0_52], %167 {strides = array<i32>} : memref<16x32xf32, #tpu.memory_space<vmem>>, vector<8x32xf32>,
    return
  }
}

</mosaic_0001>

<bundles_post_ra>
// kernel: tpu_custom_call.1
= control target key start
LH: loop header
LB: loop body
LE: loop exit
PB: predicated region body
PF: predicated region fallthrough
CT: control target
= control target key end

     0   :  { %9 = vsyncpa [#allocation3], 0  ;;  %s1379_s0 = inlined_call_operand.hbm [shape: f32[16,32], index: 0, kind: input, shape index: {}]   ;;  %s1380_s1 = inlined_call_operand.hbm [shape: f32[32,96], index: 1, kind: input, shape index: {}]   ;;  %s1381_s2 = inlined_call_operand.hbm [shape: f32[32,32], index: 2, kind: input, shape index: {}]   ;;  %s1382_s3 = inlined_call_operand.hbm [shape: f32[4,8,8], index: 3, kind: input, shape index: {}]   ;;  %s1383_s4 = inlined_call_operand.hbm [shape: f32[16,32], index: 4, kind: output, shape index: {}]  }
   0x1   :  { %10 = vsyncpa [#allocation6], 0 }
   0x2   :  { %11 = vsyncpa [#allocation9], 0 }
   0x3   :  { %12 = vsyncpa [#allocation4], 0  ;;  %s30_s17 = sshll.u32 %s1380_s1, 4  ;;  %s1171_s18 = smov [#allocation5]   ;;  %s31_s17 = int_to_ptr.hbm [resolvable:$true] %s30_s17 }
   0x4   :  { %s32_s19 = sshll.u32 %s1171_s18, 4  ;;  %s17_s22 = sshll.u32 %s1379_s0, 4  ;;  %s33_s19 = int_to_ptr.vmem [resolvable:$true] %s32_s19  ;;  %s18_s22 = int_to_ptr.hbm [resolvable:$true] %s17_s22 }
   0x5   :  { %s1172_s23 = smov 128   ;;  %s1173_s24 = smov 8  }
   0x6   :  { %38 = dma.hbm_to_vmem [thread:$0]  %s31_s17, 512, %s33_s19, [#allocation6], %s1172_s23, %s1172_s23, %s1173_s24  }
   0x7   :  { %s1174_s25 = smov [#allocation2]   ;;  %s43_s1 = sshll.u32 %s1381_s2, 4  ;;  %s44_s1 = int_to_ptr.hbm [resolvable:$true] %s43_s1 }
   0x8   :  { %s19_s26 = sshll.u32 %s1174_s25, 4  ;;  %s56_s30 = sshll.u32 %s1382_s3, 4  ;;  %s20_s26 = int_to_ptr.vmem [resolvable:$true] %s19_s26  ;;  %s57_s30 = int_to_ptr.hbm [resolvable:$true] %s56_s30 }
   0x9   :  { %25 = dma.hbm_to_vmem [thread:$0]  %s18_s22, 256, %s20_s26, [#allocation3], %s1172_s23, %s1172_s23, %s1173_s24  }
   0xa   :  { %s1175_s5 = smov [#allocation7]   ;;  %s1176_s7 = smov [#allocation8]  }
   0xb   :  { %s45_s6 = sshll.u32 %s1175_s5, 4  ;;  %s58_s2 = sshll.u32 %s1176_s7, 4  ;;  %s46_s6 = int_to_ptr.vmem [resolvable:$true] %s45_s6  ;;  %s59_s2 = int_to_ptr.vmem [resolvable:$true] %s58_s2 }
   0xc   :  { %51 = dma.hbm_to_vmem [thread:$0]  %s44_s1, 512, %s46_s6, [#allocation6], %s1172_s23, %s1172_s23, %s1173_s24  }
   0xd   :  { %64 = dma.hbm_to_vmem [thread:$0]  %s57_s30, 512, %s59_s2, [#allocation9], %s1172_s23, %s1172_s23, %s1173_s24  }
   0xe   :  { %1163 = dma.done.wait [#allocation3], 256  }
   0xf   :  { %1164 = vsyncadd [#allocation3], 4294967040 }
  0x10   :  { %1165 = dma.done.wait [#allocation6], 1024  }
  0x11   :  { %1166 = vsyncadd [#allocation6], 4294966272 }
  0x12   :  { %1167 = dma.done.wait [#allocation9], 512  }
  0x13   :  { %1168 = vsyncadd [#allocation9], 4294966784  ;;  %v86_v0 = vld [vmem:[#allocation5 + $0x18] sm:$0xff]  ;;  %v85_v1 = vld [vmem:[#allocation5 + $0x10] sm:$0xff]  ;;  %vm87_vm0 = vcmask 261120   ;;  %s1177_s3 = smov 120  }
  0x14   :  { %106 = vmatpush.msra.mxu0 %v86_v0  ;;  %v84_v2 = vld [vmem:[#allocation5 + $0x8] sm:$0xff]  ;;  %v83_v3 = vld [vmem:[#allocation5] sm:$0xff]  ;;  %v81_v4 = vld [vmem:[#allocation2] sm:$0xff]  ;;  %s1178_s8 = smov 96   ;;  %s1179_s9 = smov 88   ;;  %vm128_vm1 = vcmask 64512  }
  0x15   :  { %v82_v6 = vld [vmem:[#allocation2 + $0x8] sm:$0xff]  ;;  %v1252_v10 = vld [vmem:[#allocation8] sm:$0xff]  ;;  %v1256_v14 = vld [vmem:[#allocation8 + $0x8] sm:$0xff]  ;;  %s1180_s10 = smov 112   ;;  %s1181_s11 = smov 72  }
  0x16   :  { %107 = vmatpush.msra.mxu0 %v85_v1  ;;  %s1182_s12 = smov 64   ;;  %s1183_s13 = smov 56   ;;  %v117_v59 = vld [vmem:[#allocation7] sm:$0xff]  ;;  %v118_v60 = vld [vmem:[#allocation7 + $0x8] sm:$0xff]  ;;  %v1284_v63 = vld [vmem:[#allocation8 + $0x10] sm:$0xff] }
  0x17   :  { %s1184_s14 = smov 80   ;;  %s1185_s15 = smov 48  }
  0x18   :  { %108 = vmatpush.msra.mxu0 %v84_v2  ;;  %s1186_s16 = smov 104   ;;  %s1187_s17 = smov 40  }
  0x19   :  { %s1188_s18 = smov [#allocation10]   ;;  %s944_s22 = sshll.u32 %s1383_s4, 4  ;;  %s945_s22 = int_to_ptr.hbm [resolvable:$true] %s944_s22 }
  0x1a   :  { %109 = vmatpush.msra.mxu0 %v83_v3  ;;  %s942_s19 = sshll.u32 %s1188_s18, 4  ;;  %s943_s19 = int_to_ptr.vmem [resolvable:$true] %s942_s19 }
  0x1b   :  { %959 = vmatmul.msk.f32.vlgmr.msra.gmra.mxu0 %vm87_vm0, %v81_v4 }
  0x23   :  { %960 = vmatmul.msk.f32.gmra.mxu0 %vm87_vm0, %v82_v6 }
  0x98   :  { %v1239_v5 = vpop.f32.mrf.mxu0 }
  0x99   :  { %203 = vrot.lane.b32.xlu1 %v1239_v5, %s1177_s3  ;;  %126 = vrot.lane.b32.xlu0 %v1239_v5, %s1178_s8 }
  0xa0   :  { %v1262_v18 = vpop.f32.mrf.mxu0 }
  0xa1   :  { %205 = vrot.lane.b32.xlu0 %v1239_v5, %s1179_s9 }
 0x10b   :  { %v127_v7 = vpop.permute.xlu0 %126  ;;  %v204_v9 = vpop.permute.xlu1 %203 }
 0x10c   :  { %961 = vmatpush.xpose.msk.msra.mxu1 %vm128_vm1, %v127_v7 }
 0x10f   :  { %962 = vmatmul.msk.f32.vlgmr.msra.gmra.mxu1 %vm128_vm1, %v1239_v5 }
 0x110   :  { %299 = vmatpush.msrb.mxu1 %v118_v60 }
 0x113   :  { %v206_v8 = vpop.permute.xlu0 %205 }
 0x114   :  { %964 = vmatpush.xpose.msk.msra.mxu3 %vm128_vm1, %v206_v8 }
 0x117   :  { %965 = vmatmul.msk.f32.vlgmr.msra.gmra.mxu3 %vm128_vm1, %v204_v9 }
 0x118   :  { %322 = vmatpush.msrb.mxu3 %v117_v59 }
 0x18c   :  { %v150_v11 = vpop.f32.mrf.mxu1 }
 0x18d   :  { %v151_v12 = vadd.f32 %v150_v11, %v1252_v10 }
 0x18f   :  { %v153_v13 = vsel %vm128_vm1, %v151_v12, -inf }
 0x190   :  { %154 = vmax.xlane.f32.xlu1 %v153_v13 }
 0x19a   :  { %v228_v15 = vpop.f32.mrf.mxu3 }
 0x19b   :  { %v229_v16 = vadd.f32 %v228_v15, %v1256_v14 }
 0x19d   :  { %v231_v17 = vsel %vm128_vm1, %v229_v16, -inf }
 0x19e   :  { %232 = vmax.xlane.f32.xlu2 %v231_v17 }
 0x1a9   :  { %327 = vrot.lane.b32.xlu1 %v1239_v5, %s1180_s10 }
 0x1b1   :  { %533 = vrot.lane.b32.xlu1 %v1262_v18, %s1178_s8 }
 0x1b9   :  { %431 = vrot.lane.b32.xlu1 %v1239_v5, %s1181_s11 }
 0x203   :  { %v155_v19 = vpop.xlane.xlu1 %154 }
 0x204   :  { %v156_v20 = vsub.f32 %v151_v12, %v155_v19 }
 0x206   :  { %v157_v21 = vmul.f32 1.442695, %v156_v20 }
 0x208   :  { %1011 = vpow2.f32 %v157_v21 }
 0x20e   :  { %v1012_v22 = vpop.eup %1011 }
 0x20f   :  { %v159_v23 = vsel %vm128_vm1, %v1012_v22, 0.0 }
 0x210   :  { %160 = vadd.xlane.f32.xlu2 %v159_v23 }
 0x211   :  { %v233_v24 = vpop.xlane.xlu2 %232 }
 0x212   :  { %v234_v25 = vsub.f32 %v229_v16, %v233_v24 }
 0x214   :  { %v235_v26 = vmul.f32 1.442695, %v234_v25 }
 0x216   :  { %1013 = vpow2.f32 %v235_v26 }
 0x21b   :  { %v328_v27 = vpop.permute.xlu1 %327 }
 0x21c   :  { %v1014_v28 = vpop.eup %1013 }
 0x21d   :  { %v237_v29 = vsel %vm128_vm1, %v1014_v28, 0.0 }
 0x21e   :  { %238 = vadd.xlane.f32.xlu0 %v237_v29 }
 0x223   :  { %v1269_v30 = vpop.permute.xlu1 %533 }
 0x228   :  { %177 = vrot.lane.b32.xlu2 %v1239_v5, %s1182_s12 }
 0x22b   :  { %v432_v31 = vpop.permute.xlu1 %431 }
 0x22c   :  { %973 = vmatpush.xpose.msk.msrb.mxu0 %vm128_vm1, %v432_v31  ;;  %v1302_v31 = vld [vmem:[#allocation8 + $0x18] sm:$0xff] }
 0x230   :  { %255 = vrot.lane.b32.xlu2 %v1239_v5, %s1183_s13 }
 0x238   :  { %329 = vrot.lane.b32.xlu2 %v1239_v5, %s1184_s14 }
 0x283   :  { %v161_v32 = vpop.xlane.xlu2 %160 }
 0x284   :  { %1015 = vrcp.f32 %v161_v32  ;;  %v173_v37 = vand.u32 2147483648, %v161_v32  ;;  %v171_v39 = vand.u32 2147483647, %v161_v32  ;;  %vm167_vm3 = vweird.f32 %v161_v32 }
 0x286   :  { %v174_v42 = vor.u32 1.1754944e-38, %v173_v37  ;;  %vm172_vm5 = vcmp.eq.f32.partialorder %v171_v39, 8.507059e+37 }
 0x28a   :  { %v1016_v33 = vpop.eup %1015 }
 0x28b   :  { %v163_v34 = vmul.f32 %v1016_v33, %v161_v32  ;;  %v178_v35 = vpop.permute.xlu2 %177  ;;  %vm168_vm2 = vweird.f32 %v1016_v33 }
 0x28c   :  { %198 = vmatpush.msra.mxu2 %v178_v35  ;;  %vm169_vm4 = vmor %vm167_vm3, %vm168_vm2 }
 0x28d   :  { %v164_v36 = vsub.f32 1.0, %v163_v34 }
 0x28f   :  { %v165_v38 = vmul.f32 %v1016_v33, %v164_v36 }
 0x291   :  { %v239_v40 = vpop.xlane.xlu0 %238  ;;  %v166_v41 = vadd.f32 %v1016_v33, %v165_v38 }
 0x292   :  { %1017 = vrcp.f32 %v239_v40  ;;  %v251_v51 = vand.u32 2147483648, %v239_v40  ;;  %v249_v53 = vand.u32 2147483647, %v239_v40  ;;  %vm245_vm7 = vweird.f32 %v239_v40 }
 0x293   :  { %v256_v43 = vpop.permute.xlu2 %255  ;;  %v170_v44 = vsel %vm169_vm4, %v1016_v33, %v166_v41 }
 0x294   :  { %276 = vmatpush.msrb.mxu2 %v256_v43  ;;  %v175_v45 = vsel %vm172_vm5, %v174_v42, %v170_v44  ;;  %v252_v55 = vor.u32 1.1754944e-38, %v251_v51  ;;  %vm250_vm9 = vcmp.eq.f32.partialorder %v249_v53, 8.507059e+37 }
 0x295   :  { %v176_v46 = vmul.f32 %v1012_v22, %v175_v45 }
 0x297   :  { %963 = vmatmul.msk.f32.vlgmr.msra.gmra.mxu2 %vm128_vm1, %v176_v46 }
 0x298   :  { %v1018_v47 = vpop.eup %1017 }
 0x299   :  { %v241_v48 = vmul.f32 %v1018_v47, %v239_v40  ;;  %vm246_vm6 = vweird.f32 %v1018_v47 }
 0x29a   :  { %vm247_vm8 = vmor %vm245_vm7, %vm246_vm6 }
 0x29b   :  { %v242_v49 = vsub.f32 1.0, %v241_v48  ;;  %v330_v50 = vpop.permute.xlu2 %329 }
 0x29c   :  { %969 = vmatpush.xpose.msk.msra.mxu2 %vm128_vm1, %v330_v50 }
 0x29d   :  { %v243_v52 = vmul.f32 %v1018_v47, %v242_v49 }
 0x29f   :  { %v244_v54 = vadd.f32 %v1018_v47, %v243_v52 }
 0x2a1   :  { %v248_v56 = vsel %vm247_vm8, %v1018_v47, %v244_v54 }
 0x2a2   :  { %v253_v57 = vsel %vm250_vm9, %v252_v55, %v248_v56 }
 0x2a3   :  { %v254_v58 = vmul.f32 %v1014_v28, %v253_v57 }
 0x2a5   :  { %966 = vmatmul.msk.f32.vlgmr.msrb.gmra.mxu2 %vm128_vm1, %v254_v58 }
 0x2ad   :  { %970 = vmatmul.msk.f32.vlgmr.msra.gmra.mxu2 %vm128_vm1, %v328_v27  ;;  %v119_v27 = vld [vmem:[#allocation7 + $0x10] sm:$0xff] }
 0x2ae   :  { %423 = vmatpush.msra.mxu3 %v119_v27 }
 0x31a   :  { %v200_v61 = vpop.f32.mrf.mxu2 }
 0x31b   :  { %968 = vmatmul.msk.f32.vlgmr.msrb.gmra.mxu3 %vm128_vm1, %v200_v61 }
 0x31c   :  { %977 = vmatpush.xpose.msk.msrb.mxu3 %vm128_vm1, %v1269_v30 }
 0x328   :  { %v278_v62 = vpop.f32.mrf.mxu2 }
 0x329   :  { %967 = vmatmul.msk.f32.vlgmr.msrb.gmra.mxu1 %vm128_vm1, %v278_v62 }
 0x330   :  { %v352_v0 = vpop.f32.mrf.mxu2 }
 0x331   :  { %v353_v1 = vadd.f32 %v352_v0, %v1284_v63 }
 0x333   :  { %v355_v2 = vsel %vm128_vm1, %v353_v1, -inf }
 0x334   :  { %356 = vmax.xlane.f32.xlu2 %v355_v2 }
 0x34c   :  { %583 = vrot.lane.b32.xlu2 %v1262_v18, %s1182_s12 }
 0x39e   :  { %v1310_v30 = vpop.f32.mrf.mxu3 }
 0x3a6   :  { %v1299_v28 = vpop.f32.mrf.mxu1 }
 0x3a7   :  { %v357_v3 = vpop.xlane.xlu2 %356 }
 0x3a8   :  { %v358_v4 = vsub.f32 %v353_v1, %v357_v3 }
 0x3aa   :  { %v359_v6 = vmul.f32 1.442695, %v358_v4 }
 0x3ac   :  { %1019 = vpow2.f32 %v359_v6 }
 0x3af   :  { %v584_v9 = vpop.permute.xlu2 %583 }
 0x3b0   :  { %604 = vmatpush.msra.mxu0 %v584_v9 }
 0x3b2   :  { %v1020_v7 = vpop.eup %1019 }
 0x3b3   :  { %v361_v8 = vsel %vm128_vm1, %v1020_v7, 0.0 }
 0x3b4   :  { %362 = vadd.xlane.f32.xlu0 %v361_v8 }
 0x3c8   :  { %379 = vrot.lane.b32.xlu0 %v1239_v5, %s1185_s15 }
 0x3d0   :  { %429 = vrot.lane.b32.xlu0 %v1239_v5, %s1186_s16 }
 0x427   :  { %v363_v11 = vpop.xlane.xlu0 %362 }
 0x428   :  { %1021 = vrcp.f32 %v363_v11  ;;  %v375_v16 = vand.u32 2147483648, %v363_v11  ;;  %v373_v19 = vand.u32 2147483647, %v363_v11  ;;  %vm369_vm11 = vweird.f32 %v363_v11 }
 0x42a   :  { %v376_v21 = vor.u32 1.1754944e-38, %v375_v16  ;;  %vm374_vm13 = vcmp.eq.f32.partialorder %v373_v19, 8.507059e+37 }
 0x42e   :  { %v1022_v12 = vpop.eup %1021 }
 0x42f   :  { %v365_v13 = vmul.f32 %v1022_v12, %v363_v11  ;;  %vm370_vm10 = vweird.f32 %v1022_v12 }
 0x430   :  { %vm371_vm12 = vmor %vm369_vm11, %vm370_vm10 }
 0x431   :  { %v366_v15 = vsub.f32 1.0, %v365_v13 }
 0x433   :  { %v367_v17 = vmul.f32 %v1022_v12, %v366_v15 }
 0x435   :  { %v368_v20 = vadd.f32 %v1022_v12, %v367_v17  ;;  %v1337_v17 = vld [vmem:[#allocation7 + $0x18] sm:$0xff] }
 0x437   :  { %v372_v22 = vsel %vm371_vm12, %v1022_v12, %v368_v20 }
 0x438   :  { %v377_v23 = vsel %vm374_vm13, %v376_v21, %v372_v22 }
 0x439   :  { %v378_v24 = vmul.f32 %v1020_v7, %v377_v23 }
 0x43a   :  { %v380_v25 = vpop.permute.xlu0 %379 }
 0x43b   :  { %400 = vmatpush.msra.mxu1 %v380_v25 }
 0x43c   :  { %971 = vmatmul.msk.f32.vlgmr.msra.gmra.mxu1 %vm128_vm1, %v378_v24 }
 0x43d   :  { %525 = vmatpush.msrb.mxu1 %v1337_v17 }
 0x442   :  { %v430_v26 = vpop.permute.xlu0 %429 }
 0x443   :  { %974 = vmatmul.msk.f32.vlgmr.msrb.gmra.mxu0 %vm128_vm1, %v430_v26 }
 0x444   :  { %728 = vmatpush.msrb.mxu0 %v117_v59 }
 0x4b9   :  { %v402_v29 = vpop.f32.mrf.mxu1 }
 0x4ba   :  { %972 = vmatmul.msk.f32.vlgmr.msra.gmra.mxu3 %vm128_vm1, %v402_v29 }
 0x4bb   :  { %705 = vmatpush.msra.mxu3 %v118_v60 }
 0x4c0   :  { %v454_v32 = vpop.f32.mrf.mxu0 }
 0x4c1   :  { %v455_v33 = vadd.f32 %v454_v32, %v1302_v31  ;;  %v325_v32 = vadd.f32 %v1310_v30, %v1299_v28 }
 0x4c2   :  { %978 = vmatmul.msk.f32.vlgmr.msrb.gmra.mxu3 %vm128_vm1, %v1262_v18 }
 0x4c3   :  { %v457_v34 = vsel %vm128_vm1, %v455_v33, -inf  ;;  %829 = vmatpush.msrb.mxu3 %v119_v27 }
 0x4c4   :  { %458 = vmax.xlane.f32.xlu2 %v457_v34 }
 0x4dc   :  { %735 = vrot.lane.b32.xlu2 %v1262_v18, %s1184_s14 }
 0x537   :  { %v459_v35 = vpop.xlane.xlu2 %458 }
 0x538   :  { %v460_v37 = vsub.f32 %v455_v33, %v459_v35 }
 0x53a   :  { %v461_v38 = vmul.f32 1.442695, %v460_v37 }
 0x53c   :  { %1023 = vpow2.f32 %v461_v38 }
 0x53d   :  { %v1312_v36 = vpop.f32.mrf.mxu3 }
 0x53e   :  { %v428_v33 = vadd.f32 %v1312_v36, %v325_v32 }
 0x53f   :  { %v736_v13 = vpop.permute.xlu2 %735 }
 0x542   :  { %v1024_v42 = vpop.eup %1023 }
 0x543   :  { %v463_v43 = vsel %vm128_vm1, %v1024_v42, 0.0 }
 0x545   :  { %v556_v39 = vpop.f32.mrf.mxu3 }
 0x546   :  { %v557_v40 = vadd.f32 %v556_v39, %v1252_v10 }
 0x548   :  { %v559_v41 = vsel %vm128_vm1, %v557_v40, -inf }
 0x549   :  { %560 = vmax.xlane.f32.xlu1 %v559_v41 }
 0x551   :  { %464 = vadd.xlane.f32.xlu1 %v463_v43 }
 0x56a   :  { %611 = vrot.lane.b32.xlu1 %v1262_v18, %s1179_s9 }
 0x572   :  { %837 = vrot.lane.b32.xlu1 %v1262_v18, %s1181_s11 }
 0x5bc   :  { %v561_v44 = vpop.xlane.xlu1 %560 }
 0x5bd   :  { %v562_v45 = vsub.f32 %v557_v40, %v561_v44 }
 0x5bf   :  { %v563_v46 = vmul.f32 1.442695, %v562_v45 }
 0x5c1   :  { %1025 = vpow2.f32 %v563_v46 }
 0x5c4   :  { %v465_v48 = vpop.xlane.xlu1 %464 }
 0x5c5   :  { %1027 = vrcp.f32 %v465_v48  ;;  %v477_v56 = vand.u32 2147483648, %v465_v48  ;;  %vm471_vm15 = vweird.f32 %v465_v48  ;;  %v475_v59 = vand.u32 2147483647, %v465_v48 }
 0x5c7   :  { %v1026_v47 = vpop.eup %1025  ;;  %v478_v1 = vor.u32 1.1754944e-38, %v477_v56  ;;  %vm476_vm5 = vcmp.eq.f32.partialorder %v475_v59, 8.507059e+37 }
 0x5c8   :  { %v565_v10 = vsel %vm128_vm1, %v1026_v47, 0.0 }
 0x5c9   :  { %566 = vadd.xlane.f32.xlu0 %v565_v10 }
 0x5cb   :  { %v1028_v49 = vpop.eup %1027 }
 0x5cc   :  { %v467_v50 = vmul.f32 %v1028_v49, %v465_v48  ;;  %vm472_vm14 = vweird.f32 %v1028_v49 }
 0x5cd   :  { %vm473_vm2 = vmor %vm471_vm15, %vm472_vm14 }
 0x5ce   :  { %v468_v52 = vsub.f32 1.0, %v467_v50 }
 0x5d0   :  { %v469_v53 = vmul.f32 %v1028_v49, %v468_v52 }
 0x5dc   :  { %v612_v57 = vpop.permute.xlu1 %611 }
 0x5dd   :  { %481 = vrot.lane.b32.xlu0 %v1239_v5, %s1187_s17  ;;  %v470_v5 = vadd.f32 %v1028_v49, %v469_v53 }
 0x5df   :  { %v474_v0 = vsel %vm473_vm2, %v1028_v49, %v470_v5 }
 0x5e0   :  { %v479_v4 = vsel %vm476_vm5, %v478_v1, %v474_v0 }
 0x5e1   :  { %v480_v11 = vmul.f32 %v1024_v42, %v479_v4 }
 0x5e4   :  { %v838_v12 = vpop.permute.xlu1 %837 }
 0x5e5   :  { %609 = vrot.lane.b32.xlu0 %v1262_v18, %s1177_s3 }
 0x5ed   :  { %733 = vrot.lane.b32.xlu0 %v1262_v18, %s1180_s10 }
 0x5f5   :  { %835 = vrot.lane.b32.xlu0 %v1262_v18, %s1186_s16 }
 0x63c   :  { %v567_v51 = vpop.xlane.xlu0 %566 }
 0x63d   :  { %1029 = vrcp.f32 %v567_v51  ;;  %v579_v60 = vand.u32 2147483648, %v567_v51  ;;  %v577_v62 = vand.u32 2147483647, %v567_v51  ;;  %vm573_vm4 = vweird.f32 %v567_v51 }
 0x63f   :  { %v580_v3 = vor.u32 1.1754944e-38, %v579_v60  ;;  %vm578_vm7 = vcmp.eq.f32.partialorder %v577_v62, 8.507059e+37 }
 0x643   :  { %v1030_v54 = vpop.eup %1029 }
 0x644   :  { %v569_v55 = vmul.f32 %v1030_v54, %v567_v51  ;;  %vm574_vm3 = vweird.f32 %v1030_v54 }
 0x645   :  { %vm575_vm6 = vmor %vm573_vm4, %vm574_vm3 }
 0x646   :  { %v570_v58 = vsub.f32 1.0, %v569_v55 }
 0x648   :  { %v571_v61 = vmul.f32 %v1030_v54, %v570_v58 }
 0x64a   :  { %v572_v2 = vadd.f32 %v1030_v54, %v571_v61 }
 0x64c   :  { %v576_v6 = vsel %vm575_vm6, %v1030_v54, %v572_v2 }
 0x64d   :  { %v581_v7 = vsel %vm578_vm7, %v580_v3, %v576_v6 }
 0x64e   :  { %v582_v8 = vmul.f32 %v1026_v47, %v581_v7 }
 0x64f   :  { %v482_v9 = vpop.permute.xlu0 %481 }
 0x650   :  { %502 = vmatpush.msrb.mxu2 %v482_v9  ;;  %979 = vmatmul.msk.f32.vlgmr.msra.gmra.mxu0 %vm128_vm1, %v582_v8 }
 0x651   :  { %989 = vmatpush.xpose.msk.msra.mxu0 %vm128_vm1, %v838_v12  ;;  %975 = vmatmul.msk.f32.vlgmr.msrb.gmra.mxu2 %vm128_vm1, %v480_v11 }
 0x652   :  { %980 = vmatpush.xpose.msk.msra.mxu2 %vm128_vm1, %v612_v57 }
 0x656   :  { %985 = vmatpush.xpose.msk.msrb.mxu2 %vm128_vm1, %v736_v13 }
 0x657   :  { %v610_v15 = vpop.permute.xlu0 %609 }
 0x659   :  { %981 = vmatmul.msk.f32.vlgmr.msra.gmra.mxu2 %vm128_vm1, %v610_v15 }
 0x65f   :  { %v734_v16 = vpop.permute.xlu0 %733 }
 0x661   :  { %986 = vmatmul.msk.f32.vlgmr.msrb.gmra.mxu2 %vm128_vm1, %v734_v16 }
 0x667   :  { %v836_v21 = vpop.permute.xlu0 %835 }
 0x6cd   :  { %v606_v19 = vpop.f32.mrf.mxu0 }
 0x6ce   :  { %984 = vmatmul.msk.f32.vlgmr.msrb.gmra.mxu0 %vm128_vm1, %v606_v19 }
 0x6d4   :  { %v504_v20 = vpop.f32.mrf.mxu2 }
 0x6d5   :  { %976 = vmatmul.msk.f32.vlgmr.msrb.gmra.mxu1 %vm128_vm1, %v504_v20 }
 0x6d6   :  { %990 = vmatmul.msk.f32.vlgmr.msra.gmra.mxu0 %vm128_vm1, %v836_v21 }
 0x6dc   :  { %v634_v22 = vpop.f32.mrf.mxu2 }
 0x6dd   :  { %v635_v23 = vadd.f32 %v634_v22, %v1256_v14 }
 0x6df   :  { %v637_v24 = vsel %vm128_vm1, %v635_v23, -inf }
 0x6e0   :  { %638 = vmax.xlane.f32.xlu1 %v637_v24 }
 0x6e4   :  { %v758_v25 = vpop.f32.mrf.mxu2 }
 0x6e5   :  { %v759_v26 = vadd.f32 %v758_v25, %v1284_v63 }
 0x6e7   :  { %v761_v27 = vsel %vm128_vm1, %v759_v26, -inf }
 0x6e8   :  { %762 = vmax.xlane.f32.xlu0 %v761_v27 }
 0x74b   :  { %v1347_v29 = vpop.f32.mrf.mxu0 }
 0x752   :  { %v527_v34 = vpop.f32.mrf.mxu1 }
 0x753   :  { %v530_v35 = vadd.f32 %v527_v34, %v428_v33  ;;  %v860_v37 = vpop.f32.mrf.mxu0  ;;  %v639_v14 = vpop.xlane.xlu1 %638 }
 0x754   :  { %v861_v38 = vadd.f32 %v860_v37, %v1302_v31  ;;  %v640_v39 = vsub.f32 %v635_v23, %v639_v14 }
 0x755   :  { %531 = vst.msk [vmem:[#allocation10] sm:$0xff] %vm87_vm0, %v530_v35 }
 0x756   :  { %v641_v63 = vmul.f32 1.442695, %v640_v39  ;;  %v863_v40 = vsel %vm128_vm1, %v861_v38, -inf }
 0x757   :  { %864 = vmax.xlane.f32.xlu2 %v863_v40 }
 0x758   :  { %1031 = vpow2.f32 %v641_v63 }
 0x75b   :  { %v763_v41 = vpop.xlane.xlu0 %762 }
 0x75c   :  { %v764_v42 = vsub.f32 %v759_v26, %v763_v41 }
 0x75e   :  { %v1032_v43 = vpop.eup %1031  ;;  %v765_v28 = vmul.f32 1.442695, %v764_v42 }
 0x75f   :  { %v643_v30 = vsel %vm128_vm1, %v1032_v43, 0.0 }
 0x760   :  { %1033 = vpow2.f32 %v765_v28  ;;  %644 = vadd.xlane.f32.xlu1 %v643_v30 }
 0x766   :  { %v1034_v36 = vpop.eup %1033 }
 0x767   :  { %v767_v44 = vsel %vm128_vm1, %v1034_v36, 0.0 }
 0x768   :  { %768 = vadd.xlane.f32.xlu0 %v767_v44 }
 0x76f   :  { %661 = vrot.lane.b32.xlu2 %v1262_v18, %s1183_s13 }
 0x77c   :  { %785 = vrot.lane.b32.xlu0 %v1262_v18, %s1185_s15 }
 0x7ca   :  { %v865_v31 = vpop.xlane.xlu2 %864 }
 0x7cb   :  { %v866_v45 = vsub.f32 %v861_v38, %v865_v31 }
 0x7cd   :  { %v867_v46 = vmul.f32 1.442695, %v866_v45 }
 0x7cf   :  { %1035 = vpow2.f32 %v867_v46 }
 0x7d2   :  { %v662_v47 = vpop.permute.xlu2 %661 }
 0x7d3   :  { %682 = vmatpush.msra.mxu1 %v662_v47  ;;  %v645_v10 = vpop.xlane.xlu1 %644 }
 0x7d4   :  { %1037 = vrcp.f32 %v645_v10  ;;  %v657_v54 = vand.u32 2147483648, %v645_v10  ;;  %v655_v5 = vand.u32 2147483647, %v645_v10  ;;  %vm651_vm9 = vweird.f32 %v645_v10 }
 0x7d5   :  { %v1036_v48 = vpop.eup %1035 }
 0x7d6   :  { %v869_v49 = vsel %vm128_vm1, %v1036_v48, 0.0  ;;  %v658_v58 = vor.u32 1.1754944e-38, %v657_v54  ;;  %vm656_vm11 = vcmp.eq.f32.partialorder %v655_v5, 8.507059e+37 }
 0x7d7   :  { %870 = vadd.xlane.f32.xlu1 %v869_v49 }
 0x7da   :  { %v1038_v50 = vpop.eup %1037 }
 0x7db   :  { %v647_v51 = vmul.f32 %v1038_v50, %v645_v10  ;;  %v769_v52 = vpop.xlane.xlu0 %768  ;;  %vm652_vm8 = vweird.f32 %v1038_v50 }
 0x7dc   :  { %1039 = vrcp.f32 %v769_v52  ;;  %vm653_vm10 = vmor %vm651_vm9, %vm652_vm8  ;;  %v781_v1 = vand.u32 2147483648, %v769_v52  ;;  %v779_v3 = vand.u32 2147483647, %v769_v52  ;;  %vm775_vm13 = vweird.f32 %v769_v52 }
 0x7dd   :  { %v648_v53 = vsub.f32 1.0, %v647_v51 }
 0x7de   :  { %v782_v6 = vor.u32 1.1754944e-38, %v781_v1  ;;  %vm780_vm15 = vcmp.eq.f32.partialorder %v779_v3, 8.507059e+37 }
 0x7df   :  { %v649_v55 = vmul.f32 %v1038_v50, %v648_v53 }
 0x7e1   :  { %v650_v56 = vadd.f32 %v1038_v50, %v649_v55 }
 0x7e2   :  { %v1040_v57 = vpop.eup %1039 }
 0x7e3   :  { %v654_v59 = vsel %vm653_vm10, %v1038_v50, %v650_v56  ;;  %v771_v60 = vmul.f32 %v1040_v57, %v769_v52  ;;  %vm776_vm12 = vweird.f32 %v1040_v57 }
 0x7e4   :  { %v659_v61 = vsel %vm656_vm11, %v658_v58, %v654_v59  ;;  %vm777_vm14 = vmor %vm775_vm13, %vm776_vm12 }
 0x7e5   :  { %v772_v62 = vsub.f32 1.0, %v771_v60  ;;  %v660_v0 = vmul.f32 %v1032_v43, %v659_v61 }
 0x7e7   :  { %v773_v2 = vmul.f32 %v1040_v57, %v772_v62  ;;  %982 = vmatmul.msk.f32.vlgmr.msra.gmra.mxu1 %vm128_vm1, %v660_v0 }
 0x7e9   :  { %v774_v4 = vadd.f32 %v1040_v57, %v773_v2 }
 0x7eb   :  { %v778_v7 = vsel %vm777_vm14, %v1040_v57, %v774_v4 }
 0x7ec   :  { %v783_v8 = vsel %vm780_vm15, %v782_v6, %v778_v7 }
 0x7ed   :  { %v784_v9 = vmul.f32 %v1034_v36, %v783_v8 }
 0x7ee   :  { %v786_v11 = vpop.permute.xlu0 %785 }
 0x7ef   :  { %806 = vmatpush.msrb.mxu1 %v786_v11 }
 0x7f0   :  { %887 = vrot.lane.b32.xlu1 %v1262_v18, %s1187_s17  ;;  %987 = vmatmul.msk.f32.vlgmr.msrb.gmra.mxu1 %vm128_vm1, %v784_v9 }
 0x7f1   :  { %931 = vmatpush.msra.mxu1 %v1337_v17 }
 0x84a   :  { %v871_v12 = vpop.xlane.xlu1 %870 }
 0x84b   :  { %1041 = vrcp.f32 %v871_v12  ;;  %v883_v21 = vand.u32 2147483648, %v871_v12  ;;  %vm877_vm3 = vweird.f32 %v871_v12  ;;  %v881_v22 = vand.u32 2147483647, %v871_v12 }
 0x84d   :  { %v884_v24 = vor.u32 1.1754944e-38, %v883_v21  ;;  %vm882_vm5 = vcmp.eq.f32.partialorder %v881_v22, 8.507059e+37 }
 0x851   :  { %v1042_v13 = vpop.eup %1041 }
 0x852   :  { %v873_v15 = vmul.f32 %v1042_v13, %v871_v12  ;;  %vm878_vm2 = vweird.f32 %v1042_v13 }
 0x853   :  { %vm879_vm4 = vmor %vm877_vm3, %vm878_vm2 }
 0x854   :  { %v874_v16 = vsub.f32 1.0, %v873_v15 }
 0x856   :  { %v875_v19 = vmul.f32 %v1042_v13, %v874_v16 }
 0x858   :  { %v876_v20 = vadd.f32 %v1042_v13, %v875_v19 }
 0x85a   :  { %v880_v23 = vsel %vm879_vm4, %v1042_v13, %v876_v20 }
 0x85b   :  { %v885_v18 = vsel %vm882_vm5, %v884_v24, %v880_v23 }
 0x85c   :  { %v886_v26 = vmul.f32 %v1036_v48, %v885_v18 }
 0x862   :  { %v888_v25 = vpop.permute.xlu1 %887 }
 0x863   :  { %908 = vmatpush.msra.mxu2 %v888_v25 }
 0x864   :  { %v684_v17 = vpop.f32.mrf.mxu1  ;;  %991 = vmatmul.msk.f32.vlgmr.msra.gmra.mxu2 %vm128_vm1, %v886_v26 }
 0x865   :  { %983 = vmatmul.msk.f32.vlgmr.msra.gmra.mxu3 %vm128_vm1, %v684_v17 }
 0x86d   :  { %v808_v27 = vpop.f32.mrf.mxu1 }
 0x86e   :  { %988 = vmatmul.msk.f32.vlgmr.msrb.gmra.mxu3 %vm128_vm1, %v808_v27 }
 0x8e7   :  { %v910_v32 = vpop.f32.mrf.mxu2 }
 0x8e8   :  { %992 = vmatmul.msk.f32.vlgmr.msra.gmra.mxu1 %vm128_vm1, %v910_v32  ;;  %v707_v33 = vpop.f32.mrf.mxu3 }
 0x8e9   :  { %v731_v35 = vadd.f32 %v1347_v29, %v707_v33 }
 0x8f1   :  { %v831_v34 = vpop.f32.mrf.mxu3 }
 0x8f2   :  { %v834_v37 = vadd.f32 %v831_v34, %v731_v35 }
 0x965   :  { %v933_v14 = vpop.f32.mrf.mxu1 }
 0x966   :  { %v936_v38 = vadd.f32 %v933_v14, %v834_v37 }
 0x968   :  { %937 = vst.msk [vmem:[#allocation10 + $0x8] sm:$0xff] %vm87_vm0, %v936_v38 }
 0x969   :  { %950 = dma.vmem_to_hbm [thread:$0]  %s943_s19, 256, %s945_s22, [#allocation4], %s1172_s23, %s1172_s23, %s1173_s24  }
 0x96a   :  { %1169 = dma.done.wait [#allocation4], 256  }
 0x96b   :  { %1170 = vsyncadd [#allocation4], 4294967040 }
 0x96c   :  { %955 = vsyncpa [#allocation3], 1 }
 0x96d   :  { %956 = vsyncpa [#allocation6], 1 }
 0x96e   :  { %957 = vsyncpa [#allocation9], 1 }
 0x96f   :  { %958 = vsyncpa [#allocation4], 1 }

</bundles_post_ra>
